<compile_context>
chip_gen: v6e
topology: v6e:2x2x1
jax: 0.10.0
libtpu: 0.0.40
codegen_flags: <defaults>
</compile_context>

<pallas_src>
import functools

import jax
import jax.numpy as jnp
from jax.experimental import pallas as pl
from jax.experimental.pallas import tpu as pltpu

VMEM_LIMIT_BYTES = 32 * 1024 * 1024   # explicit: > v5e 16MiB default, < v7x physical


def _round_up(x, m):
    return (x + m - 1) // m * m


def _cparams(dims):
    return pltpu.CompilerParams(dimension_semantics=dims,
                                vmem_limit_bytes=VMEM_LIMIT_BYTES)


# --------------------------------------------------------------------------
# Fused matmul kernel:  out = relu( A @ B + bias (+ residual) )
# --------------------------------------------------------------------------

def _mm_kernel(a_ref, b_ref, bias_ref, *rest, apply_relu, has_residual, multi_k):
    if has_residual:
        res_ref = rest[0]
        rest = rest[1:]
    o_ref = rest[0]

    def epilogue(acc):
        out = acc + bias_ref[...]                      # (1, TN) broadcasts
        if has_residual:
            out = out + res_ref[...].astype(jnp.float32)
        if apply_relu:
            out = jnp.maximum(out, 0.0)
        o_ref[...] = out.astype(o_ref.dtype)

    if not multi_k:
        # Single reduction step: no scratch, no init/finalize round-trip.
        epilogue(jnp.dot(a_ref[...], b_ref[...],
                         preferred_element_type=jnp.float32))
    else:
        acc_ref = rest[1]
        k = pl.program_id(2)

        @pl.when(k == 0)
        def _():
            acc_ref[...] = jnp.zeros_like(acc_ref)

        acc_ref[...] += jnp.dot(a_ref[...], b_ref[...],
                                preferred_element_type=jnp.float32)

        @pl.when(k == pl.num_programs(2) - 1)
        def _():
            epilogue(acc_ref[...])


def matmul_fused(a, b, bias, *, relu, residual=None, out_dtype=jnp.bfloat16):
    """(M,K) @ (K,N) + bias[1,N] (+ residual[M,N]), optional ReLU. bf16 in, f32 acc."""
    M, K = a.shape
    K2, N = b.shape
    assert K == K2 and bias.shape == (1, N)

    # --- tile selection -----------------------------------------------------
    if M >= 4096:
        TM = 512
    elif M >= 256:
        TM = 256
    else:
        TM = _round_up(max(M, 8), 8)
    Mp = _round_up(M, TM)

    if N >= 256:
        TN = 256
        if Mp // TM == 1 and N == 256:
            TN = 128          # guarantee >=2 parallel blocks (v7x dual TensorCore)
    else:
        TN = N                # 64 / 128 channel outputs: full-dim lane block
    Np = _round_up(N, TN)

    if K <= 2304:
        TK = K                # whole-K: single reduction step
    else:
        TK = next((c for c in (2304, 2048, 1536, 1280, 1152, 1024, 768, 640, 512)
                   if K % c == 0), 512)
    Kp = _round_up(K, TK)
    multi_k = (Kp // TK) > 1

    # --- padding fast path (no-op for every matmul in this network) ----------
    def pad2(x, r, c):
        if x.shape == (r, c):
            return x
        return jnp.pad(x, ((0, r - x.shape[0]), (0, c - x.shape[1])))

    a_p = pad2(a.astype(jnp.bfloat16), Mp, Kp)
    b_p = pad2(b, Kp, Np)
    bias_p = bias if bias.shape[1] == Np else jnp.pad(bias, ((0, 0), (0, Np - N)))

    inputs = [a_p, b_p, bias_p]
    in_specs = [
        pl.BlockSpec((TM, TK), lambda j, i, k: (i, k)),
        pl.BlockSpec((TK, TN), lambda j, i, k: (k, j)),
        pl.BlockSpec((1, TN), lambda j, i, k: (0, j)),
    ]
    has_residual = residual is not None
    if has_residual:
        inputs.append(pad2(residual.astype(jnp.bfloat16), Mp, Np))
        in_specs.append(pl.BlockSpec((TM, TN), lambda j, i, k: (i, j)))

    # j (weight panel) outermost so the B panel is reused across M tiles.
    grid = (Np // TN, Mp // TM, Kp // TK)
    scratch = [pltpu.VMEM((TM, TN), jnp.float32)] if multi_k else []

    out = pl.pallas_call(
        functools.partial(_mm_kernel, apply_relu=relu,
                          has_residual=has_residual, multi_k=multi_k),
        out_shape=jax.ShapeDtypeStruct((Mp, Np), out_dtype),
        grid=grid,
        in_specs=in_specs,
        out_specs=pl.BlockSpec((TM, TN), lambda j, i, k: (i, j)),
        scratch_shapes=scratch,
        compiler_params=_cparams(("parallel", "parallel", "arbitrary")),
    )(*inputs)
    if (Mp, Np) != (M, N):
        out = out[:M, :N]
    return out


# --------------------------------------------------------------------------
# Direct 3x3 stride-1 conv kernel (no im2col): taps folded into the reduction.
# The padded image is flattened to rows of width Wp=W+2; tap (di,dj) is then a
# contiguous row-slice at offset di*Wp+dj.  Columns W..W+1 of each output row
# are wrap-around garbage and are sliced off afterwards.
# --------------------------------------------------------------------------

def _conv3x3_kernel(x_ref, w_ref, bias_ref, o_ref, *, tap_offsets, cin, m,
                    apply_relu):
    cout = o_ref.shape[-1]
    acc = jnp.zeros((m, cout), jnp.float32)
    for t, off in enumerate(tap_offsets):
        a = x_ref[0, off:off + m, :]                      # (m, cin) bf16
        wt = w_ref[t * cin:(t + 1) * cin, :]              # (cin, cout) bf16
        acc = acc + jnp.dot(a, wt, preferred_element_type=jnp.float32)
    out = acc + bias_ref[...]
    if apply_relu:
        out = jnp.maximum(out, 0.0)
    o_ref[0, :, :] = out.astype(o_ref.dtype)


def conv3x3_direct(x, w_mat, bias, *, relu):
    n, h, w, cin = x.shape
    cout = w_mat.shape[1]
    wp = w + 2
    # pad: 1 top / 2 bottom / 1 left / 1 right; the extra bottom row keeps the
    # last tap's row-slice in bounds.
    xp = jnp.pad(x, ((0, 0), (1, 2), (1, 1), (0, 0)))
    r = (h + 3) * wp
    xf = xp.reshape(n, r, cin)                            # free contiguous merge
    m = h * wp
    tap_offsets = tuple(di * wp + dj for di in range(3) for dj in range(3))

    out = pl.pallas_call(
        functools.partial(_conv3x3_kernel, tap_offsets=tap_offsets,
                          cin=cin, m=m, apply_relu=relu),
        out_shape=jax.ShapeDtypeStruct((n, m, cout), jnp.bfloat16),
        grid=(n,),
        in_specs=[
            pl.BlockSpec((1, r, cin), lambda i: (i, 0, 0)),
            pl.BlockSpec((9 * cin, cout), lambda i: (0, 0)),
            pl.BlockSpec((1, cout), lambda i: (0, 0)),
        ],
        out_specs=pl.BlockSpec((1, m, cout), lambda i: (i, 0, 0)),
        compiler_params=_cparams(("parallel",)),
    )(xf, w_mat, bias)
    return out.reshape(n, h, wp, cout)[:, :, :w, :]


# --------------------------------------------------------------------------
# Max pool (3x3/s2): fused maximum tree (single pass, no 9x materialization).
# --------------------------------------------------------------------------

def maxpool2d(x, k, stride, pad):
    n, h, w, c = x.shape
    neg = jnp.asarray(jnp.finfo(x.dtype).min, x.dtype)
    xp = jnp.pad(x, ((0, 0), (pad, pad), (pad, pad), (0, 0)), constant_values=neg)
    oh = (h + 2 * pad - k) // stride + 1
    ow = (w + 2 * pad - k) // stride + 1
    out = None
    for di in range(k):
        for dj in range(k):
            s = xp[:, di:di + stride * oh:stride, dj:dj + stride * ow:stride, :]
            out = s if out is None else jnp.maximum(out, s)
    return out


# --------------------------------------------------------------------------
# Fused head: global average pool -> fc1 -> ReLU -> fc2  (one Pallas call)
# --------------------------------------------------------------------------

def _head_kernel(x_ref, w1_ref, b1_ref, w2_ref, b2_ref, o_ref):
    pooled = jnp.mean(x_ref[...].astype(jnp.float32), axis=1)          # (N, C)
    h = jnp.dot(pooled.astype(jnp.bfloat16), w1_ref[...],
                preferred_element_type=jnp.float32)
    h = jnp.maximum(h + b1_ref[...], 0.0)
    logits = jnp.dot(h.astype(jnp.bfloat16), w2_ref[...],
                     preferred_element_type=jnp.float32)
    o_ref[...] = logits + b2_ref[...]


def head_forward(x, params):
    n, h, w, c = x.shape
    x2 = x.reshape(n, h * w, c)
    w1, b1 = params['fc1']
    w2, b2 = params['fc2']
    npad = w2.shape[1]
    out = pl.pallas_call(
        _head_kernel,
        out_shape=jax.ShapeDtypeStruct((n, npad), jnp.float32),
        grid=(1,),
        in_specs=[
            pl.BlockSpec((n, h * w, c), lambda i: (0, 0, 0)),
            pl.BlockSpec(w1.shape, lambda i: (0, 0)),
            pl.BlockSpec(b1.shape, lambda i: (0, 0)),
            pl.BlockSpec(w2.shape, lambda i: (0, 0)),
            pl.BlockSpec(b2.shape, lambda i: (0, 0)),
        ],
        out_specs=pl.BlockSpec((n, npad), lambda i: (0, 0)),
        compiler_params=_cparams(("arbitrary",)),
    )(x2, w1, b1, w2, b2)
    return out[:, :params['num_classes']]


# --------------------------------------------------------------------------
# Conv dispatcher (folded BatchNorm): direct 3x3 kernel / 1x1 matmul / im2col
# --------------------------------------------------------------------------

def conv2d_bn_act(x, p, *, stride, pad, relu, residual=None):
    """x: NHWC bf16.  p = (w_mat[K,Cout] bf16, shift[1,Cout] f32, kh, kw)."""
    w_mat, bias, kh, kw = p
    n, h, w_, cin = x.shape
    cout = w_mat.shape[1]

    if kh == 1 and kw == 1 and pad == 0:
        if stride > 1:
            x = x[:, ::stride, ::stride, :]
        oh, ow = x.shape[1], x.shape[2]
        patches = x.reshape(n * oh * ow, cin)
        res2 = None if residual is None else residual.reshape(n * oh * ow, cout)
        out = matmul_fused(patches, w_mat, bias, relu=relu, residual=res2)
        return out.reshape(n, oh, ow, cout)

    if kh == 3 and kw == 3 and stride == 1 and pad == 1 and residual is None:
        return conv3x3_direct(x, w_mat, bias, relu=relu)

    # Fallback: im2col (7x7/s2 stem and the three stride-2 3x3 convs).
    # TODO(synk): fold strided taps into the Pallas reduction as well.
    xp = jnp.pad(x, ((0, 0), (pad, pad), (pad, pad), (0, 0)))
    oh = (h + 2 * pad - kh) // stride + 1
    ow = (w_ + 2 * pad - kw) // stride + 1
    cols = [xp[:, di:di + stride * oh:stride, dj:dj + stride * ow:stride, :]
            for di in range(kh) for dj in range(kw)]
    patches = jnp.concatenate(cols, axis=-1).reshape(n * oh * ow, kh * kw * cin)
    res2 = None if residual is None else residual.reshape(n * oh * ow, cout)
    out = matmul_fused(patches, w_mat, bias, relu=relu, residual=res2)
    return out.reshape(n, oh, ow, cout)


# --------------------------------------------------------------------------
# Parameters (BN folded, weights pre-cast/pre-shaped/pre-padded at init)
# --------------------------------------------------------------------------

def init_params(key, num_classes):
    counter = [0]

    def nk():
        counter[0] += 1
        return jax.random.fold_in(key, counter[0])

    def conv_bn(cout, cin, kh, kw):
        std = (2.0 / (cin * kh * kw)) ** 0.5
        w = jax.random.normal(nk(), (cout, cin, kh, kw), jnp.float32) * std
        gamma = jax.random.uniform(nk(), (cout,), jnp.float32, 0.5, 1.5)
        beta = jax.random.normal(nk(), (cout,), jnp.float32) * 0.1
        mean = jnp.zeros((cout,), jnp.float32)
        var = jnp.ones((cout,), jnp.float32)
        eps = 1e-5
        scale = gamma / jnp.sqrt(var + eps)
        shift = beta - mean * scale
        w_f = w * scale[:, None, None, None]
        # (kh, kw, cin, cout): rows grouped by tap (di, dj), cin fastest.
        w_mat = jnp.transpose(w_f, (2, 3, 1, 0)).reshape(kh * kw * cin, cout)
        return (w_mat.astype(jnp.bfloat16),
                shift.reshape(1, cout).astype(jnp.float32), kh, kw)

    def linear(cout, cin, pad_to=None):
        std = (1.0 / cin) ** 0.5
        w = jax.random.normal(nk(), (cout, cin), jnp.float32) * std
        b = jax.random.normal(nk(), (cout,), jnp.float32) * 0.01
        wt = w.T
        b2 = b.reshape(1, cout)
        if pad_to is not None and pad_to > cout:
            wt = jnp.pad(wt, ((0, 0), (0, pad_to - cout)))
            b2 = jnp.pad(b2, ((0, 0), (0, pad_to - cout)))
        return (wt.astype(jnp.bfloat16), b2.astype(jnp.float32))

    params = {'conv1': conv_bn(64, 3, 7, 7)}
    cin = 64
    cfg = [('layer1', 64, 3, 1), ('layer2', 128, 4, 2),
           ('layer3', 256, 6, 2), ('layer4', 512, 3, 2)]
    for name, width, nblocks, stride in cfg:
        blocks = []
        for b in range(nblocks):
            s = stride if b == 0 else 1
            cout = width * 4
            blk = {
                'conv1': conv_bn(width, cin, 1, 1),
                'conv2': conv_bn(width, width, 3, 3),
                'conv3': conv_bn(cout, width, 1, 1),
                'stride': s,
            }
            if s != 1 or cin != cout:
                blk['downsample'] = conv_bn(cout, cin, 1, 1)
            blocks.append(blk)
            cin = cout
        params[name] = blocks
    params['fc1'] = linear(512, 2048)
    params['fc2'] = linear(num_classes, 512, pad_to=_round_up(num_classes, 128))
    params['num_classes'] = num_classes
    return params


# --------------------------------------------------------------------------
# Forward pass
# --------------------------------------------------------------------------

def bottleneck_forward(x, p):
    identity = x
    out = conv2d_bn_act(x, p['conv1'], stride=1, pad=0, relu=True)
    out = conv2d_bn_act(out, p['conv2'], stride=p['stride'], pad=1, relu=True)
    if 'downsample' in p:
        identity = conv2d_bn_act(x, p['downsample'],
                                 stride=p['stride'], pad=0, relu=False)
    # conv3 + BN bias + residual add + ReLU fused into one matmul epilogue.
    return conv2d_bn_act(out, p['conv3'], stride=1, pad=0, relu=True,
                         residual=identity)


def bird_classifier_forward(params, x_nchw):
    x = jnp.transpose(x_nchw, (0, 2, 3, 1)).astype(jnp.bfloat16)   # NCHW -> NHWC
    x = conv2d_bn_act(x, params['conv1'], stride=2, pad=3, relu=True)
    x = maxpool2d(x, 3, 2, 1)
    for layer in ('layer1', 'layer2', 'layer3', 'layer4'):
        for blk in params[layer]:
            x = bottleneck_forward(x, blk)
    # Head: avgpool -> Dropout(id) -> Linear(2048,512) -> ReLU -> Dropout(id)
    #       -> Linear(512,num_classes), fused in one Pallas call.
    return head_forward(x, params)


if __name__ == "__main__":
    key = jax.random.PRNGKey(0)
    num_classes = 10
    params = init_params(jax.random.fold_in(key, 1), num_classes)
    # Small but ResNet-compatible input: batch=2, 3 channels, 64x64 spatial (NCHW).
    x = jax.random.normal(jax.random.fold_in(key, 2), (2, 3, 64, 64), jnp.float32)
    logits = bird_classifier_forward(params, x)
    logits = jax.block_until_ready(logits)
    assert logits.shape == (2, num_classes)
    assert bool(jnp.all(jnp.isfinite(logits)))
    print("KERNEL_OK")
</pallas_src>

<mosaic_0001>
module attributes {stable_mosaic.version = 11 : i64} {
  func.func @_mm_kernel(%arg0: i32, %arg1: i32, %arg2: i32, %arg3: memref<256x147xbf16, #tpu.memory_space<vmem>>, %arg4: memref<147x64xbf16, #tpu.memory_space<vmem>>, %arg5: memref<1x64xf32, #tpu.memory_space<vmem>>, %arg6: memref<256x64xbf16, #tpu.memory_space<vmem>>) attributes {dimension_semantics = [#tpu.dimension_semantics<parallel>, #tpu.dimension_semantics<parallel>, #tpu.dimension_semantics<arbitrary>], iteration_bounds = array<i64: 1, 8, 1>, scalar_prefetch = 0 : i64, scratch_operands = 0 : i64, tpu.core_type = #tpu.core_type<tc>, window_params = [{transform_indices = @transform_0, window_bounds = array<i64: 256, 147>}, {transform_indices = @transform_1, window_bounds = array<i64: 147, 64>}, {transform_indices = @transform_2, window_bounds = array<i64: 1, 64>}, {transform_indices = @transform_3, window_bounds = array<i64: 256, 64>}]} {
    %c0 = arith.constant 0 : index
    %c0_0 = arith.constant 0 : index
    %0 = vector.load %arg3[%c0, %c0_0] : memref<256x147xbf16, #tpu.memory_space<vmem>>, vector<256x147xbf16>
    %c0_1 = arith.constant 0 : index
    %c0_2 = arith.constant 0 : index
    %1 = vector.load %arg4[%c0_1, %c0_2] : memref<147x64xbf16, #tpu.memory_space<vmem>>, vector<147x64xbf16>
    %cst = arith.constant dense<0.000000e+00> : vector<256x64xf32>
    %2 = tpu.matmul %0, %1, %cst {dimension_numbers = #tpu.dot_dimension_numbers<[1], [0], [0], [1], [0, 0, 1, 1], [], []>} : vector<256x147xbf16>, vector<147x64xbf16>, vector<256x64xf32> -> vector<256x64xf32>
    %c0_3 = arith.constant 0 : index
    %c0_4 = arith.constant 0 : index
    %3 = vector.load %arg5[%c0_3, %c0_4] : memref<1x64xf32, #tpu.memory_space<vmem>>, vector<1x64xf32>
    %4 = vector.broadcast %3 : vector<1x64xf32> to vector<256x64xf32>
    %5 = arith.addf %2, %4 : vector<256x64xf32>
    %cst_5 = arith.constant 0.000000e+00 : f32
    %6 = vector.broadcast %cst_5 : f32 to vector<256x64xf32>
    %7 = arith.maximumf %5, %6 : vector<256x64xf32>
    %8 = arith.truncf %7 : vector<256x64xf32> to vector<256x64xbf16>
    %c0_6 = arith.constant 0 : index
    %c0_7 = arith.constant 0 : index
    %9 = vector.load %arg6[%c0_6, %c0_7] : memref<256x64xbf16, #tpu.memory_space<vmem>>, vector<256x64xbf16>
    tpu.vector_store %arg6[%c0_6, %c0_7], %8 {strides = array<i32>} : memref<256x64xbf16, #tpu.memory_space<vmem>>, vector<256x64xbf16>,
    return
  }
  func.func @transform_0(%arg0: i32, %arg1: i32, %arg2: i32) -> (i32, i32) {
    %c0_i32 = arith.constant 0 : i32
    return %arg1, %arg2 : i32, i32
  }
  func.func @transform_1(%arg0: i32, %arg1: i32, %arg2: i32) -> (i32, i32) {
    %c0_i32 = arith.constant 0 : i32
    return %arg2, %arg0 : i32, i32
  }
  func.func @transform_2(%arg0: i32, %arg1: i32, %arg2: i32) -> (i32, i32) {
    %c0_i32 = arith.constant 0 : i32
    %c0_i32_0 = arith.constant 0 : i32
    return %c0_i32, %arg0 : i32, i32
  }
  func.func @transform_3(%arg0: i32, %arg1: i32, %arg2: i32) -> (i32, i32) {
    %c0_i32 = arith.constant 0 : i32
    return %arg1, %arg0 : i32, i32
  }
}

</mosaic_0001>

<bundles_post_ra>
// kernel: tpu_custom_call.1
= control target key start
LH: loop header
LB: loop body
LE: loop exit
PB: predicated region body
PF: predicated region fallthrough
CT: control target
= control target key end

     0   :  { %s1339_s12 = smov 0   ;;  %s1341_s13 = smov 0   ;;  %s1559_s0 = inlined_call_operand.vmem [shape: bf16[2048,147], index: 0, kind: input, shape index: {}]   ;;  %s1560_s1 = inlined_call_operand.vmem [shape: bf16[147,64], index: 1, kind: input, shape index: {}]   ;;  %s1561_s2 = inlined_call_operand.vmem [shape: f32[1,64], index: 2, kind: input, shape index: {}]   ;;  %s1562_s3 = inlined_call_operand.vmem [shape: bf16[2048,64], index: 3, kind: output, shape index: {}]  }
   0x1   :  { %s1343_s14 = smov 0  }
   0x2 LB: > { %s28_s15 = sadd.s32 1, %s1311_s13  ;;  %p1057_p0 = scmp.ge.s32.totalorder %s1315_s14, 1  ;;  %s1315_s14 = sphi %s1343_s14, %s13_s14   ;;  %s1311_s13 = sphi %s1341_s13, %s1564_s13   ;;  %s1307_s12 = sphi %s1339_s12, %s1563_s12  }
   0x3   : > { %p30_p1 = scmp.ge.s32.totalorder %s28_s15, 8  ;;  %p191_p2 = scmp.lt.s32.totalorder %s1315_s14, 9 }
   0x5   : > { %s1566_s15 = smov (%p30_p1, %s28_s15), 0  ;;  %p192_p3 = pnand %p1057_p0, %p191_p2 }
   0x6   : > { %s1058_s22 = sshll.u32 (!%p192_p3), %s1307_s12, 5 }
   0x7   : > { %195 = sbr.rel (%p192_p3) target bundleno = 313 (0x139), region = 32  ;;  %p236_p4 = scmp.lt.s32.totalorder (!%p192_p3), %s1058_s22, 255 }
   0xc   : > { %v1235_v0 = vld [vmem:[%s1560_s1 + $0x38] sm:$0xff]   ;;  %v1317_v1 = vmov 0   ;;  %v1236_v2 = vld [vmem:[%s1560_s1 + $0x30] sm:$0xff]   ;;  %v1237_v3 = vld [vmem:[%s1560_s1 + $0x28] sm:$0xff]   ;;  %s1568_s22 = smov (!%p236_p4, %s1058_s22), 255  ;;  %vm527_vm0 = vcmask 154624  }
   0xd   : > { %583 = vmatprep.subr.bf16.mxu0 %v1317_v1  ;;  %1189 = vmatprep.subr.bf16.mxu1 %v1317_v1  ;;  %v1238_v4 = vld [vmem:[%s1560_s1 + $0x20] sm:$0xff]   ;;  %s1156_s25 = sshll.u32 %s1568_s22, 3  ;;  %v1239_v5 = vld [vmem:[%s1560_s1 + $0x18] sm:$0xff]   ;;  %v1240_v8 = vld [vmem:[%s1560_s1 + $0x10] sm:$0xff]   ;;  %vm576_vm1 = vcmask 1040384   ;;  %vm577_vm2 = vcmask 1041408  }
   0xe   : > { %584 = vmatpush1.bf16.msra.mxu0 %v1235_v0  ;;  %1199 = vmatpush1.bf16.msra.mxu1 %v1235_v0  ;;  %s1375_s28 = scalar_lea.vmem %s1559_s0, %s1156_s25  ;;  %v1241_v9 = vld [vmem:[%s1560_s1 + $0x8] sm:$0xff]   ;;  %v1318_v10 = vmov 65535   ;;  %v1242_v12 = vld [vmem:[%s1560_s1] sm:$0xff]   ;;  %s1062_s19 = sshll.u32 %s1568_s22, 2  ;;  %vm904_vm3 = vcmask 519168  }
   0xf   : > { %585 = vmatprep.subr.bf16.mxu0 %v1317_v1  ;;  %1190 = vmatprep.subr.bf16.mxu1 %v1317_v1  ;;  %v1247_v6 = vld [vmem:[%s1375_s28 + $0x4] ss:$8 sps:$4 sm:$0xff]   ;;  %v578_v11 = vsel %vm576_vm1, 4294967295, %v1318_v10  ;;  %v1243_v13 = vld [vmem:[%s1560_s1 + $0x48] ss:$0 sps:$4 sm:$0x33]   ;;  %s1454_s23 = scalar_lea.vmem %s1562_s3, %s1062_s19 }
  0x10   : > { %v1250_v7 = vld [vmem:[%s1375_s28 + $0x84] ss:$8 sps:$4 sm:$0xff]   ;;  %1106 = vmatprep.mubr.msk.bf16.mxu0 %vm527_vm0, %v1247_v6  ;;  %v579_v14 = vsel %vm577_vm2, %v578_v11, 0  ;;  %v1245_v17 = vld [vmem:[%s1375_s28] ss:$8 sps:$4 sm:$0xff]  }
  0x11   : > { %1114 = vmatprep.mubr.msk.bf16.mxu1 %vm527_vm0, %v1250_v7  ;;  %v581_v15 = vand.u32 %v1243_v13, %v579_v14  ;;  %v1244_v16 = vld [vmem:[%s1560_s1 + $0x40] sm:$0xff]   ;;  %v1251_v19 = vld [vmem:[%s1375_s28 + $0x14] ss:$8 sps:$4 sm:$0xff]   ;;  %v1255_v21 = vld [vmem:[%s1375_s28 + $0x10] ss:$8 sps:$4 sm:$0xff]  }
  0x12   : > { %586 = vmatpush1.bf16.msra.mxu0 %v1236_v2  ;;  %1200 = vmatpush1.bf16.msra.mxu1 %v1236_v2  ;;  %v1248_v18 = vld [vmem:[%s1375_s28 + $0x80] ss:$8 sps:$4 sm:$0xff]   ;;  %v1253_v20 = vld [vmem:[%s1375_s28 + $0x94] ss:$8 sps:$4 sm:$0xff]   ;;  %v1256_v22 = vld [vmem:[%s1375_s28 + $0x90] ss:$8 sps:$4 sm:$0xff]  }
  0x13   : > { %587 = vmatprep.subr.bf16.mxu0 %v1317_v1  ;;  %1191 = vmatprep.subr.bf16.mxu1 %v1317_v1  ;;  %v1257_v23 = vld [vmem:[%s1375_s28 + $0x24] ss:$8 sps:$4 sm:$0xff]   ;;  %v1261_v25 = vld [vmem:[%s1375_s28 + $0x20] ss:$8 sps:$4 sm:$0xff]   ;;  %v1263_v27 = vld [vmem:[%s1375_s28 + $0x34] ss:$8 sps:$4 sm:$0xff]  }
  0x14   : > { %v1259_v24 = vld [vmem:[%s1375_s28 + $0xa4] ss:$8 sps:$4 sm:$0xff]   ;;  %v1262_v26 = vld [vmem:[%s1375_s28 + $0xa0] ss:$8 sps:$4 sm:$0xff]   ;;  %v1265_v28 = vld [vmem:[%s1375_s28 + $0xb4] ss:$8 sps:$4 sm:$0xff]  }
  0x15   : > { %v1267_v29 = vld [vmem:[%s1375_s28 + $0x30] ss:$8 sps:$4 sm:$0xff]   ;;  %v1269_v31 = vld [vmem:[%s1375_s28 + $0x44] ss:$8 sps:$4 sm:$0xff]   ;;  %v1273_v33 = vld [vmem:[%s1375_s28 + $0x40] ss:$8 sps:$4 sm:$0xff]  }
  0x16   : > { %588 = vmatpush1.bf16.msra.mxu0 %v1237_v3  ;;  %1201 = vmatpush1.bf16.msra.mxu1 %v1237_v3  ;;  %v1268_v30 = vld [vmem:[%s1375_s28 + $0xb0] ss:$8 sps:$4 sm:$0xff]   ;;  %v1271_v32 = vld [vmem:[%s1375_s28 + $0xc4] ss:$8 sps:$4 sm:$0xff]   ;;  %v1274_v34 = vld [vmem:[%s1375_s28 + $0xc0] ss:$8 sps:$4 sm:$0xff]  }
  0x17   : > { %589 = vmatprep.subr.bf16.mxu0 %v1317_v1  ;;  %1192 = vmatprep.subr.bf16.mxu1 %v1317_v1  ;;  %v1275_v35 = vld [vmem:[%s1375_s28 + $0x54] ss:$8 sps:$4 sm:$0xff]   ;;  %v1279_v37 = vld [vmem:[%s1375_s28 + $0x50] ss:$8 sps:$4 sm:$0xff]   ;;  %v1281_v39 = vld [vmem:[%s1375_s28 + $0x64] ss:$8 sps:$4 sm:$0xff]  }
  0x18   : > { %v1277_v36 = vld [vmem:[%s1375_s28 + $0xd4] ss:$8 sps:$4 sm:$0xff]   ;;  %v1280_v38 = vld [vmem:[%s1375_s28 + $0xd0] ss:$8 sps:$4 sm:$0xff]   ;;  %v1283_v40 = vld [vmem:[%s1375_s28 + $0xe4] ss:$8 sps:$4 sm:$0xff]  }
  0x19   : > { %v1285_v41 = vld [vmem:[%s1375_s28 + $0x60] ss:$8 sps:$4 sm:$0xff]   ;;  %v1287_v43 = vld [vmem:[%s1375_s28 + $0x74] ss:$8 sps:$4 sm:$0xff]   ;;  %v1291_v45 = vld [vmem:[%s1375_s28 + $0x70] ss:$8 sps:$4 sm:$0xff]  }
  0x1a   : > { %590 = vmatpush1.bf16.msra.mxu0 %v1238_v4  ;;  %1202 = vmatpush1.bf16.msra.mxu1 %v1238_v4  ;;  %v1286_v42 = vld [vmem:[%s1375_s28 + $0xe0] ss:$8 sps:$4 sm:$0xff]   ;;  %v1289_v44 = vld [vmem:[%s1375_s28 + $0xf4] ss:$8 sps:$4 sm:$0xff]   ;;  %v1292_v46 = vld [vmem:[%s1375_s28 + $0xf0] ss:$8 sps:$4 sm:$0xff]  }
  0x1b   : > { %591 = vmatprep.subr.bf16.mxu0 %v1317_v1  ;;  %1193 = vmatprep.subr.bf16.mxu1 %v1317_v1  ;;  %v1446_v47 = vld [vmem:[%s1561_s2] ss:$0 sm:$0xff] }
  0x1e   : > { %592 = vmatpush1.bf16.msra.mxu0 %v1239_v5  ;;  %1203 = vmatpush1.bf16.msra.mxu1 %v1239_v5 }
  0x1f   : > { %593 = vmatprep.subr.bf16.mxu0 %v1317_v1  ;;  %1194 = vmatprep.subr.bf16.mxu1 %v1317_v1 }
  0x22   : > { %594 = vmatpush1.bf16.msra.mxu0 %v1240_v8  ;;  %1204 = vmatpush1.bf16.msra.mxu1 %v1240_v8 }
  0x23   : > { %595 = vmatprep.subr.bf16.mxu0 %v1317_v1  ;;  %1195 = vmatprep.subr.bf16.mxu1 %v1317_v1 }
  0x26   : > { %596 = vmatpush1.bf16.msra.mxu0 %v1241_v9  ;;  %1205 = vmatpush1.bf16.msra.mxu1 %v1241_v9 }
  0x27   : > { %597 = vmatprep.subr.bf16.mxu0 %v1317_v1  ;;  %1196 = vmatprep.subr.bf16.mxu1 %v1317_v1 }
  0x2a   : > { %598 = vmatpush1.bf16.msra.mxu0 %v1242_v12  ;;  %1206 = vmatpush1.bf16.msra.mxu1 %v1242_v12 }
  0x2b   : > { %611 = vmatprep.subr.bf16.mxu0 %v1317_v1  ;;  %1197 = vmatprep.subr.bf16.mxu1 %v1317_v1 }
  0x2e   : > { %612 = vmatpush2.bf16.msra.mxu0 %v581_v15  ;;  %1207 = vmatpush2.bf16.msra.mxu1 %v581_v15 }
  0x2f   : > { %613 = vmatprep.subr.bf16.mxu0 %v1317_v1  ;;  %1198 = vmatprep.subr.bf16.mxu1 %v1317_v1 }
  0x32   : > { %614 = vmatpush2.bf16.msra.mxu0 %v1244_v16  ;;  %1208 = vmatpush2.bf16.msra.mxu1 %v1244_v16 }
  0x35   : > { %616 = vmatmul.mubr.bf16.vlgmr.msra.gmra.mxu0 %v1245_v17  ;;  %680 = vmatmul.mubr.bf16.vlgmr.msra.gmra.mxu1 %v1248_v18 }
  0x36   : > { %1107 = vmatprep.mubr.msk.bf16.mxu0 %vm527_vm0, %v1251_v19  ;;  %1115 = vmatprep.mubr.msk.bf16.mxu1 %vm527_vm0, %v1253_v20 }
  0x3d   : > { %624 = vmatmul.mubr.bf16.gmra.mxu0 %v1255_v21  ;;  %688 = vmatmul.mubr.bf16.gmra.mxu1 %v1256_v22 }
  0x3e   : > { %1108 = vmatprep.mubr.msk.bf16.mxu0 %vm527_vm0, %v1257_v23  ;;  %1116 = vmatprep.mubr.msk.bf16.mxu1 %vm527_vm0, %v1259_v24 }
  0x45   : > { %632 = vmatmul.mubr.bf16.gmra.mxu0 %v1261_v25  ;;  %696 = vmatmul.mubr.bf16.gmra.mxu1 %v1262_v26 }
  0x46   : > { %1109 = vmatprep.mubr.msk.bf16.mxu0 %vm527_vm0, %v1263_v27  ;;  %1117 = vmatprep.mubr.msk.bf16.mxu1 %vm527_vm0, %v1265_v28 }
  0x4d   : > { %640 = vmatmul.mubr.bf16.gmra.mxu0 %v1267_v29  ;;  %704 = vmatmul.mubr.bf16.gmra.mxu1 %v1268_v30 }
  0x4e   : > { %1110 = vmatprep.mubr.msk.bf16.mxu0 %vm527_vm0, %v1269_v31  ;;  %1118 = vmatprep.mubr.msk.bf16.mxu1 %vm527_vm0, %v1271_v32 }
  0x55   : > { %648 = vmatmul.mubr.bf16.gmra.mxu0 %v1273_v33  ;;  %712 = vmatmul.mubr.bf16.gmra.mxu1 %v1274_v34 }
  0x56   : > { %1111 = vmatprep.mubr.msk.bf16.mxu0 %vm527_vm0, %v1275_v35  ;;  %1119 = vmatprep.mubr.msk.bf16.mxu1 %vm527_vm0, %v1277_v36 }
  0x5d   : > { %656 = vmatmul.mubr.bf16.gmra.mxu0 %v1279_v37  ;;  %720 = vmatmul.mubr.bf16.gmra.mxu1 %v1280_v38 }
  0x5e   : > { %1112 = vmatprep.mubr.msk.bf16.mxu0 %vm527_vm0, %v1281_v39  ;;  %1120 = vmatprep.mubr.msk.bf16.mxu1 %vm527_vm0, %v1283_v40 }
  0x65   : > { %664 = vmatmul.mubr.bf16.gmra.mxu0 %v1285_v41  ;;  %728 = vmatmul.mubr.bf16.gmra.mxu1 %v1286_v42 }
  0x66   : > { %1113 = vmatprep.mubr.msk.bf16.mxu0 %vm527_vm0, %v1287_v43  ;;  %1121 = vmatprep.mubr.msk.bf16.mxu1 %vm527_vm0, %v1289_v44 }
  0x6d   : > { %672 = vmatmul.mubr.bf16.gmra.mxu0 %v1291_v45  ;;  %736 = vmatmul.mubr.bf16.gmra.mxu1 %v1292_v46 }
  0xf5   : > { %v617_v48 = vpop.f32.mrf.mxu0  ;;  %v681_v49 = vpop.f32.mrf.mxu1 }
  0xf6   : > { %v618_v50 = vadd.f32 %v1446_v47, %v617_v48  ;;  %v682_v51 = vadd.f32 %v1446_v47, %v681_v49 }
  0xf7   : > { %v619_v52 = vpop.f32.mrf.mxu0  ;;  %v683_v53 = vpop.f32.mrf.mxu1 }
  0xf8   : > { %v744_v54 = vmax.f32 %v618_v50, 0.0  ;;  %v760_v55 = vmax.f32 %v682_v51, 0.0 }
  0xf9   : > { %v620_v56 = vpop.f32.mrf.mxu0  ;;  %v684_v57 = vpop.f32.mrf.mxu1 }
  0xfa   : > { %v1157_v58 = vpack.c.bf16 %v744_v54, %v744_v54  ;;  %v1173_v59 = vpack.c.bf16 %v760_v55, %v760_v55  ;;  %v621_v60 = vadd.f32 %v1446_v47, %v620_v56  ;;  %v685_v61 = vadd.f32 %v1446_v47, %v684_v57 }
  0xfb   : > { %v622_v62 = vpop.f32.mrf.mxu0  ;;  %v686_v63 = vpop.f32.mrf.mxu1 }
  0xfc   : > { %905 = vst.msk [vmem:[%s1454_s23] sm:$0xf] %vm904_vm3, %v1157_v58  ;;  %921 = vst.msk [vmem:[%s1454_s23 + $0x40] sm:$0xf] %vm904_vm3, %v1173_v59  ;;  %v745_v0 = vmax.f32 %v621_v60, 0.0  ;;  %v761_v1 = vmax.f32 %v685_v61, 0.0 }
  0xfd   : > { %v625_v2 = vpop.f32.mrf.mxu0  ;;  %v689_v3 = vpop.f32.mrf.mxu1 }
  0xfe   : > { %v1158_v4 = vpack.c.bf16 %v745_v0, %v745_v0  ;;  %v1174_v5 = vpack.c.bf16 %v761_v1, %v761_v1  ;;  %v626_v6 = vadd.f32 %v1446_v47, %v625_v2  ;;  %v690_v7 = vadd.f32 %v1446_v47, %v689_v3 }
  0xff   : > { %v627_v8 = vpop.f32.mrf.mxu0  ;;  %v691_v9 = vpop.f32.mrf.mxu1 }
 0x100   : > { %906 = vst.msk [vmem:[%s1454_s23 + $0x4] sm:$0xf] %vm904_vm3, %v1158_v4  ;;  %922 = vst.msk [vmem:[%s1454_s23 + $0x44] sm:$0xf] %vm904_vm3, %v1174_v5  ;;  %v746_v10 = vmax.f32 %v626_v6, 0.0  ;;  %v762_v11 = vmax.f32 %v690_v7, 0.0 }
 0x101   : > { %v628_v12 = vpop.f32.mrf.mxu0  ;;  %v692_v13 = vpop.f32.mrf.mxu1 }
 0x102   : > { %v1159_v14 = vpack.c.bf16 %v746_v10, %v746_v10  ;;  %v1175_v15 = vpack.c.bf16 %v762_v11, %v762_v11  ;;  %v629_v16 = vadd.f32 %v1446_v47, %v628_v12  ;;  %v693_v17 = vadd.f32 %v1446_v47, %v692_v13 }
 0x103   : > { %v630_v18 = vpop.f32.mrf.mxu0  ;;  %v694_v19 = vpop.f32.mrf.mxu1 }
 0x104   : > { %907 = vst.msk [vmem:[%s1454_s23 + $0x8] sm:$0xf] %vm904_vm3, %v1159_v14  ;;  %923 = vst.msk [vmem:[%s1454_s23 + $0x48] sm:$0xf] %vm904_vm3, %v1175_v15  ;;  %v747_v20 = vmax.f32 %v629_v16, 0.0  ;;  %v763_v21 = vmax.f32 %v693_v17, 0.0 }
 0x105   : > { %v633_v22 = vpop.f32.mrf.mxu0  ;;  %v697_v23 = vpop.f32.mrf.mxu1 }
 0x106   : > { %v1160_v24 = vpack.c.bf16 %v747_v20, %v747_v20  ;;  %v1176_v25 = vpack.c.bf16 %v763_v21, %v763_v21  ;;  %v634_v26 = vadd.f32 %v1446_v47, %v633_v22  ;;  %v698_v27 = vadd.f32 %v1446_v47, %v697_v23 }
 0x107   : > { %v635_v28 = vpop.f32.mrf.mxu0  ;;  %v699_v29 = vpop.f32.mrf.mxu1 }
 0x108   : > { %908 = vst.msk [vmem:[%s1454_s23 + $0xc] sm:$0xf] %vm904_vm3, %v1160_v24  ;;  %924 = vst.msk [vmem:[%s1454_s23 + $0x4c] sm:$0xf] %vm904_vm3, %v1176_v25  ;;  %v748_v30 = vmax.f32 %v634_v26, 0.0  ;;  %v764_v31 = vmax.f32 %v698_v27, 0.0 }
 0x109   : > { %v636_v32 = vpop.f32.mrf.mxu0  ;;  %v700_v33 = vpop.f32.mrf.mxu1 }
 0x10a   : > { %v1161_v34 = vpack.c.bf16 %v748_v30, %v748_v30  ;;  %v1177_v35 = vpack.c.bf16 %v764_v31, %v764_v31  ;;  %v637_v36 = vadd.f32 %v1446_v47, %v636_v32  ;;  %v701_v37 = vadd.f32 %v1446_v47, %v700_v33 }
 0x10b   : > { %v638_v38 = vpop.f32.mrf.mxu0  ;;  %v702_v39 = vpop.f32.mrf.mxu1 }
 0x10c   : > { %909 = vst.msk [vmem:[%s1454_s23 + $0x10] sm:$0xf] %vm904_vm3, %v1161_v34  ;;  %925 = vst.msk [vmem:[%s1454_s23 + $0x50] sm:$0xf] %vm904_vm3, %v1177_v35  ;;  %v749_v40 = vmax.f32 %v637_v36, 0.0  ;;  %v765_v41 = vmax.f32 %v701_v37, 0.0 }
 0x10d   : > { %v641_v42 = vpop.f32.mrf.mxu0  ;;  %v705_v43 = vpop.f32.mrf.mxu1 }
 0x10e   : > { %v1162_v44 = vpack.c.bf16 %v749_v40, %v749_v40  ;;  %v1178_v45 = vpack.c.bf16 %v765_v41, %v765_v41  ;;  %v642_v46 = vadd.f32 %v1446_v47, %v641_v42  ;;  %v706_v48 = vadd.f32 %v1446_v47, %v705_v43 }
 0x10f   : > { %v643_v49 = vpop.f32.mrf.mxu0  ;;  %v707_v50 = vpop.f32.mrf.mxu1 }
 0x110   : > { %910 = vst.msk [vmem:[%s1454_s23 + $0x14] sm:$0xf] %vm904_vm3, %v1162_v44  ;;  %926 = vst.msk [vmem:[%s1454_s23 + $0x54] sm:$0xf] %vm904_vm3, %v1178_v45  ;;  %v750_v51 = vmax.f32 %v642_v46, 0.0  ;;  %v766_v52 = vmax.f32 %v706_v48, 0.0 }
 0x111   : > { %v644_v53 = vpop.f32.mrf.mxu0  ;;  %v708_v54 = vpop.f32.mrf.mxu1 }
 0x112   : > { %v1163_v55 = vpack.c.bf16 %v750_v51, %v750_v51  ;;  %v1179_v56 = vpack.c.bf16 %v766_v52, %v766_v52  ;;  %v645_v57 = vadd.f32 %v1446_v47, %v644_v53  ;;  %v709_v58 = vadd.f32 %v1446_v47, %v708_v54 }
 0x113   : > { %v646_v59 = vpop.f32.mrf.mxu0  ;;  %v710_v60 = vpop.f32.mrf.mxu1 }
 0x114   : > { %911 = vst.msk [vmem:[%s1454_s23 + $0x18] sm:$0xf] %vm904_vm3, %v1163_v55  ;;  %927 = vst.msk [vmem:[%s1454_s23 + $0x58] sm:$0xf] %vm904_vm3, %v1179_v56  ;;  %v751_v61 = vmax.f32 %v645_v57, 0.0  ;;  %v767_v62 = vmax.f32 %v709_v58, 0.0 }
 0x115   : > { %v649_v63 = vpop.f32.mrf.mxu0  ;;  %v713_v0 = vpop.f32.mrf.mxu1 }
 0x116   : > { %v1164_v1 = vpack.c.bf16 %v751_v61, %v751_v61  ;;  %v1180_v2 = vpack.c.bf16 %v767_v62, %v767_v62  ;;  %v650_v3 = vadd.f32 %v1446_v47, %v649_v63  ;;  %v714_v4 = vadd.f32 %v1446_v47, %v713_v0 }
 0x117   : > { %v651_v5 = vpop.f32.mrf.mxu0  ;;  %v715_v6 = vpop.f32.mrf.mxu1 }
 0x118   : > { %912 = vst.msk [vmem:[%s1454_s23 + $0x1c] sm:$0xf] %vm904_vm3, %v1164_v1  ;;  %928 = vst.msk [vmem:[%s1454_s23 + $0x5c] sm:$0xf] %vm904_vm3, %v1180_v2  ;;  %v752_v7 = vmax.f32 %v650_v3, 0.0  ;;  %v768_v8 = vmax.f32 %v714_v4, 0.0 }
 0x119   : > { %v652_v9 = vpop.f32.mrf.mxu0  ;;  %v716_v10 = vpop.f32.mrf.mxu1 }
 0x11a   : > { %v1165_v11 = vpack.c.bf16 %v752_v7, %v752_v7  ;;  %v1181_v12 = vpack.c.bf16 %v768_v8, %v768_v8  ;;  %v653_v13 = vadd.f32 %v1446_v47, %v652_v9  ;;  %v717_v14 = vadd.f32 %v1446_v47, %v716_v10 }
 0x11b   : > { %v654_v15 = vpop.f32.mrf.mxu0  ;;  %v718_v16 = vpop.f32.mrf.mxu1 }
 0x11c   : > { %913 = vst.msk [vmem:[%s1454_s23 + $0x20] sm:$0xf] %vm904_vm3, %v1165_v11  ;;  %929 = vst.msk [vmem:[%s1454_s23 + $0x60] sm:$0xf] %vm904_vm3, %v1181_v12  ;;  %v753_v17 = vmax.f32 %v653_v13, 0.0  ;;  %v769_v18 = vmax.f32 %v717_v14, 0.0 }
 0x11d   : > { %v657_v19 = vpop.f32.mrf.mxu0  ;;  %v721_v20 = vpop.f32.mrf.mxu1 }
 0x11e   : > { %v1166_v21 = vpack.c.bf16 %v753_v17, %v753_v17  ;;  %v1182_v22 = vpack.c.bf16 %v769_v18, %v769_v18  ;;  %v658_v23 = vadd.f32 %v1446_v47, %v657_v19  ;;  %v722_v24 = vadd.f32 %v1446_v47, %v721_v20 }
 0x11f   : > { %v659_v25 = vpop.f32.mrf.mxu0  ;;  %v723_v26 = vpop.f32.mrf.mxu1 }
 0x120   : > { %914 = vst.msk [vmem:[%s1454_s23 + $0x24] sm:$0xf] %vm904_vm3, %v1166_v21  ;;  %930 = vst.msk [vmem:[%s1454_s23 + $0x64] sm:$0xf] %vm904_vm3, %v1182_v22  ;;  %v754_v27 = vmax.f32 %v658_v23, 0.0  ;;  %v770_v28 = vmax.f32 %v722_v24, 0.0 }
 0x121   : > { %v660_v29 = vpop.f32.mrf.mxu0  ;;  %v724_v30 = vpop.f32.mrf.mxu1 }
 0x122   : > { %v1167_v31 = vpack.c.bf16 %v754_v27, %v754_v27  ;;  %v1183_v32 = vpack.c.bf16 %v770_v28, %v770_v28  ;;  %v661_v33 = vadd.f32 %v1446_v47, %v660_v29  ;;  %v725_v34 = vadd.f32 %v1446_v47, %v724_v30 }
 0x123   : > { %v662_v35 = vpop.f32.mrf.mxu0  ;;  %v726_v36 = vpop.f32.mrf.mxu1 }
 0x124   : > { %915 = vst.msk [vmem:[%s1454_s23 + $0x28] sm:$0xf] %vm904_vm3, %v1167_v31  ;;  %931 = vst.msk [vmem:[%s1454_s23 + $0x68] sm:$0xf] %vm904_vm3, %v1183_v32  ;;  %v755_v37 = vmax.f32 %v661_v33, 0.0  ;;  %v771_v38 = vmax.f32 %v725_v34, 0.0 }
 0x125   : > { %v665_v39 = vpop.f32.mrf.mxu0  ;;  %v729_v40 = vpop.f32.mrf.mxu1 }
 0x126   : > { %v1168_v41 = vpack.c.bf16 %v755_v37, %v755_v37  ;;  %v1184_v42 = vpack.c.bf16 %v771_v38, %v771_v38  ;;  %v666_v43 = vadd.f32 %v1446_v47, %v665_v39  ;;  %v730_v44 = vadd.f32 %v1446_v47, %v729_v40 }
 0x127   : > { %v667_v45 = vpop.f32.mrf.mxu0  ;;  %v731_v46 = vpop.f32.mrf.mxu1 }
 0x128   : > { %916 = vst.msk [vmem:[%s1454_s23 + $0x2c] sm:$0xf] %vm904_vm3, %v1168_v41  ;;  %932 = vst.msk [vmem:[%s1454_s23 + $0x6c] sm:$0xf] %vm904_vm3, %v1184_v42  ;;  %v756_v48 = vmax.f32 %v666_v43, 0.0  ;;  %v772_v49 = vmax.f32 %v730_v44, 0.0 }
 0x129   : > { %v668_v50 = vpop.f32.mrf.mxu0  ;;  %v732_v51 = vpop.f32.mrf.mxu1 }
 0x12a   : > { %v1169_v52 = vpack.c.bf16 %v756_v48, %v756_v48  ;;  %v1185_v53 = vpack.c.bf16 %v772_v49, %v772_v49  ;;  %v669_v54 = vadd.f32 %v1446_v47, %v668_v50  ;;  %v733_v55 = vadd.f32 %v1446_v47, %v732_v51 }
 0x12b   : > { %v670_v56 = vpop.f32.mrf.mxu0  ;;  %v734_v57 = vpop.f32.mrf.mxu1 }
 0x12c   : > { %917 = vst.msk [vmem:[%s1454_s23 + $0x30] sm:$0xf] %vm904_vm3, %v1169_v52  ;;  %933 = vst.msk [vmem:[%s1454_s23 + $0x70] sm:$0xf] %vm904_vm3, %v1185_v53  ;;  %v757_v58 = vmax.f32 %v669_v54, 0.0  ;;  %v773_v59 = vmax.f32 %v733_v55, 0.0 }
 0x12d   : > { %v673_v60 = vpop.f32.mrf.mxu0  ;;  %v737_v61 = vpop.f32.mrf.mxu1 }
 0x12e   : > { %v1170_v62 = vpack.c.bf16 %v757_v58, %v757_v58  ;;  %v1186_v63 = vpack.c.bf16 %v773_v59, %v773_v59  ;;  %v674_v0 = vadd.f32 %v1446_v47, %v673_v60  ;;  %v738_v1 = vadd.f32 %v1446_v47, %v737_v61 }
 0x12f   : > { %v675_v2 = vpop.f32.mrf.mxu0  ;;  %v739_v3 = vpop.f32.mrf.mxu1 }
 0x130   : > { %918 = vst.msk [vmem:[%s1454_s23 + $0x34] sm:$0xf] %vm904_vm3, %v1170_v62  ;;  %934 = vst.msk [vmem:[%s1454_s23 + $0x74] sm:$0xf] %vm904_vm3, %v1186_v63  ;;  %v758_v4 = vmax.f32 %v674_v0, 0.0  ;;  %v774_v5 = vmax.f32 %v738_v1, 0.0 }
 0x131   : > { %v676_v6 = vpop.f32.mrf.mxu0  ;;  %v740_v7 = vpop.f32.mrf.mxu1 }
 0x132   : > { %v1171_v8 = vpack.c.bf16 %v758_v4, %v758_v4  ;;  %v1187_v9 = vpack.c.bf16 %v774_v5, %v774_v5  ;;  %v677_v10 = vadd.f32 %v1446_v47, %v676_v6  ;;  %v741_v11 = vadd.f32 %v1446_v47, %v740_v7 }
 0x133   : > { %v678_v12 = vpop.f32.mrf.mxu0  ;;  %v742_v13 = vpop.f32.mrf.mxu1 }
 0x134   : > { %919 = vst.msk [vmem:[%s1454_s23 + $0x38] sm:$0xf] %vm904_vm3, %v1171_v8  ;;  %935 = vst.msk [vmem:[%s1454_s23 + $0x78] sm:$0xf] %vm904_vm3, %v1187_v9  ;;  %v759_v14 = vmax.f32 %v677_v10, 0.0  ;;  %v775_v15 = vmax.f32 %v741_v11, 0.0 }
 0x136   : > { %v1172_v16 = vpack.c.bf16 %v759_v14, %v759_v14  ;;  %v1188_v17 = vpack.c.bf16 %v775_v15, %v775_v15 }
 0x138   : > { %920 = vst.msk [vmem:[%s1454_s23 + $0x3c] sm:$0xf] %vm904_vm3, %v1172_v16  ;;  %936 = vst.msk [vmem:[%s1454_s23 + $0x7c] sm:$0xf] %vm904_vm3, %v1188_v17 }
 0x139 PF: > { %s13_s14 = sadd.s32 1, %s1315_s14   ;;  %s1563_s12 = smov %s1311_s13 }
 0x13a   : > { %p10_p5 = scmp.ge.s32.totalorder %s13_s14, 10   ;;  %s1564_s13 = smov %s1566_s15 }
 0x13c   :  { %12 = sbr.rel (!%p10_p5) target bundleno = 2 (0x2), region = 68 }

</bundles_post_ra>
